<compile_context>
chip_gen: v7x
topology: tpu7x:2x2x1
jax: 0.10.0
libtpu: 0.0.40
codegen_flags: <defaults>
</compile_context>

<pallas_src>
import math

import jax
import jax.numpy as jnp
from jax.experimental import pallas as pl
from jax.experimental.pallas import tpu as pltpu


# ----------------------------------------------------------------------------
# Fused kernels:  out = SiLU( (X @ W_eff) + shift )
# ----------------------------------------------------------------------------
def _fused_kernel_single_k(x_ref, w_ref, h_ref, o_ref):
    # K fits in one tile: accumulate inside the MXU result path, no VMEM scratch.
    z = jnp.dot(x_ref[...].astype(jnp.bfloat16), w_ref[...],
                preferred_element_type=jnp.float32)
    z = z + h_ref[...]                                   # f32 shift (BN beta + bias fold)
    o_ref[...] = (z * jax.nn.sigmoid(z)).astype(o_ref.dtype)   # SiLU in f32


def _fused_kernel_multi_k(x_ref, w_ref, h_ref, o_ref, acc_ref):
    k = pl.program_id(2)

    @pl.when(k == 0)
    def _():
        acc_ref[...] = jnp.zeros_like(acc_ref)

    acc_ref[...] += jnp.dot(x_ref[...].astype(jnp.bfloat16), w_ref[...],
                            preferred_element_type=jnp.float32)

    @pl.when(k == pl.num_programs(2) - 1)
    def _():
        z = acc_ref[...] + h_ref[...]
        o_ref[...] = (z * jax.nn.sigmoid(z)).astype(o_ref.dtype)


# ----------------------------------------------------------------------------
# Tiling helpers
# ----------------------------------------------------------------------------
def _round_up(a, b):
    return (a + b - 1) // b * b


def _pick_m_tile(m):
    """Pick (TM, padded M). Prefer a TM that divides M exactly -> no wrapper pad pass."""
    for t in (512, 384, 256, 128):
        if m % t == 0:
            return t, m
    if m <= 512:
        for t in (64, 32, 16):
            if m % t == 0:
                return t, m
        t = _round_up(m, 16)
        return t, t            # single (padded) M tile
    return 256, _round_up(m, 256)


# ----------------------------------------------------------------------------
# Parameters: torch-like Linear init + synthetic BN stats, folded and pre-padded
# ----------------------------------------------------------------------------
def make_params(key, in_channels, out_channels, eps=1e-5):
    assert out_channels >= in_channels
    k1, k2, k3, k4, k5, k6 = jax.random.split(key, 6)
    bound = 1.0 / math.sqrt(in_channels)
    w = jax.random.uniform(k1, (in_channels, out_channels), jnp.float32, -bound, bound)
    b = jax.random.uniform(k2, (out_channels,), jnp.float32, -bound, bound)
    gamma = 1.0 + 0.1 * jax.random.normal(k3, (out_channels,), jnp.float32)
    beta = 0.1 * jax.random.normal(k4, (out_channels,), jnp.float32)
    rmean = 0.1 * jax.random.normal(k5, (out_channels,), jnp.float32)
    rvar = 1.0 + jnp.abs(0.1 * jax.random.normal(k6, (out_channels,), jnp.float32))

    scale = gamma / jnp.sqrt(rvar + eps)
    shift = beta + scale * (b - rmean)

    # Fold BN scale and the residual add (x into the first Cin outputs) into W.
    w_eff = w * scale[None, :] + jnp.eye(in_channels, out_channels, dtype=jnp.float32)

    # N tiling: lane-dense tiles up to 512.
    n_pad = _round_up(out_channels, 128)
    tn = next(t for t in (512, 256, 128) if n_pad % t == 0)

    # K tiling: single K step whenever Cin fits one tile (no K padding at all);
    # otherwise tile K by 512 and use the VMEM accumulator path.
    if in_channels <= 1024:
        tk, k_pad = in_channels, in_channels
    else:
        tk = 512
        k_pad = _round_up(in_channels, tk)

    # Pre-pad + pre-cast once at init (no per-call weight copies).
    w_pad = (jnp.zeros((k_pad, n_pad), jnp.bfloat16)
             .at[:in_channels, :out_channels].set(w_eff.astype(jnp.bfloat16)))
    h_pad = (jnp.zeros((1, n_pad), jnp.float32)
             .at[0, :out_channels].set(shift))

    return dict(w=w_pad, shift=h_pad, cin=in_channels, cout=out_channels,
                tk=tk, tn=tn, k_pad=k_pad, n_pad=n_pad)


# ----------------------------------------------------------------------------
# Forward (closure over static tiling config + pre-padded weights, jitted)
# ----------------------------------------------------------------------------
def make_forward(params, out_dtype=jnp.bfloat16):
    # out_dtype defaults to bf16 (halves the dominant HBM write); pass
    # jnp.float32 if a downstream consumer truly needs full precision.
    w_pad, h_pad = params["w"], params["shift"]
    cin, cout = params["cin"], params["cout"]
    tk, tn = params["tk"], params["tn"]
    k_pad, n_pad = params["k_pad"], params["n_pad"]
    single_k = (k_pad == tk)
    VMEM_LIMIT = 48 * 1024 * 1024   # ~10 MiB used; safe on v5e/v6e/v7x

    @jax.jit
    def forward(x):
        B, H, W, C = x.shape
        assert C == cin
        m = B * H * W
        tm, m_pad = _pick_m_tile(m)
        gm, gn = m_pad // tm, n_pad // tn

        # v7x has 2 TensorCores: keep the parallel grid >= 2 iterations if possible.
        if gm * gn < 2:
            half = tm // 2
            if half >= 16 and half % 16 == 0 and m_pad % half == 0:
                tm = half
                gm = m_pad // tm

        x2 = x.reshape(m, C)
        if m_pad != m or k_pad != C:
            # Awkward shapes: one fused pad+cast pass in the wrapper.
            xk = (jnp.zeros((m_pad, k_pad), jnp.bfloat16)
                  .at[:m, :C].set(x2.astype(jnp.bfloat16)))
        elif gn > 2:
            # x is re-read once per N strip; pre-casting to bf16 halves that traffic.
            xk = x2.astype(jnp.bfloat16)
        else:
            # Aligned + few N strips: feed f32 x directly, cast to bf16 in-kernel
            # (saves an entire wrapper-side HBM round trip of the activation).
            xk = x2

        if single_k:
            out = pl.pallas_call(
                _fused_kernel_single_k,
                out_shape=jax.ShapeDtypeStruct((m_pad, n_pad), out_dtype),
                grid_spec=pltpu.PrefetchScalarGridSpec(
                    num_scalar_prefetch=0,
                    grid=(gm, gn),
                    in_specs=[
                        pl.BlockSpec((tm, tk), lambda i, j: (i, 0)),
                        pl.BlockSpec((tk, tn), lambda i, j: (0, j)),
                        pl.BlockSpec((1, tn), lambda i, j: (0, j)),
                    ],
                    out_specs=pl.BlockSpec((tm, tn), lambda i, j: (i, j)),
                ),
                compiler_params=pltpu.CompilerParams(
                    dimension_semantics=("parallel", "parallel"),
                    vmem_limit_bytes=VMEM_LIMIT),
            )(xk, w_pad, h_pad)
        else:
            gk = k_pad // tk
            out = pl.pallas_call(
                _fused_kernel_multi_k,
                out_shape=jax.ShapeDtypeStruct((m_pad, n_pad), out_dtype),
                grid_spec=pltpu.PrefetchScalarGridSpec(
                    num_scalar_prefetch=0,
                    grid=(gm, gn, gk),
                    in_specs=[
                        pl.BlockSpec((tm, tk), lambda i, j, k: (i, k)),
                        pl.BlockSpec((tk, tn), lambda i, j, k: (k, j)),
                        pl.BlockSpec((1, tn), lambda i, j, k: (0, j)),
                    ],
                    out_specs=pl.BlockSpec((tm, tn), lambda i, j, k: (i, j)),
                    scratch_shapes=[pltpu.VMEM((tm, tn), jnp.float32)],
                ),
                compiler_params=pltpu.CompilerParams(
                    dimension_semantics=("parallel", "parallel", "arbitrary"),
                    vmem_limit_bytes=VMEM_LIMIT),
            )(xk, w_pad, h_pad)

        if m_pad != m or n_pad != cout:
            out = out[:m, :cout]           # only when actually padded
        return out.reshape(B, H, W, cout)  # reshape alone is free

    return forward


# ----------------------------------------------------------------------------
# Pure-JAX reference for correctness checking (same bf16 operand quantization)
# ----------------------------------------------------------------------------
def _reference_same_quant(x, params):
    cin, cout = params["cin"], params["cout"]
    w = params["w"][:cin, :cout].astype(jnp.float32)   # bf16-quantized folded weight
    h = params["shift"][0, :cout]
    xq = x.reshape(-1, cin).astype(jnp.bfloat16).astype(jnp.float32)
    z = xq @ w + h[None, :]
    y = z * jax.nn.sigmoid(z)
    return y.reshape(x.shape[:-1] + (cout,))


if __name__ == "__main__":
    B, H, W = 2, 16, 16
    CIN, COUT = 64, 128

    key = jax.random.PRNGKey(0)
    kparam, kx = jax.random.split(key)
    params = make_params(kparam, CIN, COUT)
    x = jax.random.normal(kx, (B, H, W, CIN), jnp.float32)

    forward = make_forward(params)                 # bf16 output by default
    out = jax.block_until_ready(forward(x))

    assert out.shape == (B, H, W, COUT), out.shape
    assert out.dtype == jnp.bfloat16, out.dtype
    out_f32 = out.astype(jnp.float32)
    assert bool(jnp.all(jnp.isfinite(out_f32)))

    ref = _reference_same_quant(x, params)
    err = float(jnp.max(jnp.abs(out_f32 - ref)))
    # f32-accumulation noise + bf16 output rounding (<= |v| * 2^-8)
    tol = 4e-3 + float(jnp.max(jnp.abs(ref))) * 2.0 ** -8
    assert err < tol, f"kernel vs reference max abs err = {err} (tol {tol})"

    print("KERNEL_OK")
</pallas_src>

<mosaic_0001>
module attributes {stable_mosaic.version = 11 : i64} {
  func.func @_fused_kernel_single_k(%arg0: i32, %arg1: i32, %arg2: memref<256x64xf32, #tpu.memory_space<vmem>>, %arg3: memref<64x128xbf16, #tpu.memory_space<vmem>>, %arg4: memref<1x128xf32, #tpu.memory_space<vmem>>, %arg5: memref<256x128xbf16, #tpu.memory_space<vmem>>) attributes {dimension_semantics = [#tpu.dimension_semantics<parallel>, #tpu.dimension_semantics<parallel>], iteration_bounds = array<i64: 2, 1>, scalar_prefetch = 0 : i64, scratch_operands = 0 : i64, tpu.core_type = #tpu.core_type<tc>, window_params = [{transform_indices = @transform_0, window_bounds = array<i64: 256, 64>}, {transform_indices = @transform_1, window_bounds = array<i64: 64, 128>}, {transform_indices = @transform_2, window_bounds = array<i64: 1, 128>}, {transform_indices = @transform_3, window_bounds = array<i64: 256, 128>}]} {
    %c0 = arith.constant 0 : index
    %c0_0 = arith.constant 0 : index
    %0 = vector.load %arg2[%c0, %c0_0] : memref<256x64xf32, #tpu.memory_space<vmem>>, vector<256x64xf32>
    %1 = arith.truncf %0 : vector<256x64xf32> to vector<256x64xbf16>
    %c0_1 = arith.constant 0 : index
    %c0_2 = arith.constant 0 : index
    %2 = vector.load %arg3[%c0_1, %c0_2] : memref<64x128xbf16, #tpu.memory_space<vmem>>, vector<64x128xbf16>
    %cst = arith.constant dense<0.000000e+00> : vector<256x128xf32>
    %3 = tpu.matmul %1, %2, %cst {dimension_numbers = #tpu.dot_dimension_numbers<[1], [0], [0], [1], [0, 0, 1, 1], [], []>} : vector<256x64xbf16>, vector<64x128xbf16>, vector<256x128xf32> -> vector<256x128xf32>
    %c0_3 = arith.constant 0 : index
    %c0_4 = arith.constant 0 : index
    %4 = vector.load %arg4[%c0_3, %c0_4] : memref<1x128xf32, #tpu.memory_space<vmem>>, vector<1x128xf32>
    %5 = vector.broadcast %4 : vector<1x128xf32> to vector<256x128xf32>
    %6 = arith.addf %3, %5 : vector<256x128xf32>
    %7 = arith.negf %6 : vector<256x128xf32>
    %8 = math.exp %7 : vector<256x128xf32>
    %cst_5 = arith.constant 1.000000e+00 : f32
    %9 = vector.broadcast %cst_5 : f32 to vector<256x128xf32>
    %10 = arith.addf %9, %8 : vector<256x128xf32>
    %11 = arith.divf %9, %10 : vector<256x128xf32>
    %12 = arith.mulf %6, %11 : vector<256x128xf32>
    %13 = arith.truncf %12 : vector<256x128xf32> to vector<256x128xbf16>
    %c0_6 = arith.constant 0 : index
    %c0_7 = arith.constant 0 : index
    %14 = vector.load %arg5[%c0_6, %c0_7] : memref<256x128xbf16, #tpu.memory_space<vmem>>, vector<256x128xbf16>
    tpu.vector_store %arg5[%c0_6, %c0_7], %13 {strides = array<i32>} : memref<256x128xbf16, #tpu.memory_space<vmem>>, vector<256x128xbf16>,
    return
  }
  func.func @transform_0(%arg0: i32, %arg1: i32) -> (i32, i32) {
    %c0_i32 = arith.constant 0 : i32
    %c0_i32_0 = arith.constant 0 : i32
    return %arg0, %c0_i32 : i32, i32
  }
  func.func @transform_1(%arg0: i32, %arg1: i32) -> (i32, i32) {
    %c0_i32 = arith.constant 0 : i32
    %c0_i32_0 = arith.constant 0 : i32
    return %c0_i32, %arg1 : i32, i32
  }
  func.func @transform_2(%arg0: i32, %arg1: i32) -> (i32, i32) {
    %c0_i32 = arith.constant 0 : i32
    %c0_i32_0 = arith.constant 0 : i32
    return %c0_i32, %arg1 : i32, i32
  }
  func.func @transform_3(%arg0: i32, %arg1: i32) -> (i32, i32) {
    %c0_i32 = arith.constant 0 : i32
    return %arg0, %arg1 : i32, i32
  }
}

</mosaic_0001>

<bundles_post_ra>
// kernel: forward.1
= control target key start
LH: loop header
LB: loop body
LE: loop exit
PB: predicated region body
PF: predicated region fallthrough
CT: control target
= control target key end

     0   :  { %8 = vsyncpa [#allocation3], 0  ;;  %s2214_s0 = inlined_call_operand.hbm [shape: f32[512,64], index: 0, kind: input, shape index: {}]   ;;  %s2215_s1 = inlined_call_operand.hbm [shape: bf16[64,128], index: 1, kind: input, shape index: {}]   ;;  %s2216_s2 = inlined_call_operand.vmem [shape: f32[1,128], index: 2, kind: input, shape index: {}]   ;;  %s2217_s3 = inlined_call_operand.hbm [shape: bf16[512,128], index: 3, kind: output, shape index: {}]  }
   0x1   :  { %10 = vsyncpa [#allocation3 + $0x1], 0 }
   0x2   :  { %11 = vsyncpa [#allocation6], 0 }
   0x3   :  { %12 = vsyncpa [#allocation4], 0 }
   0x4   :  { %14 = vsyncpa [#allocation4 + $0x1], 0  ;;  %s1731_s12 = smov 0   ;;  %s1733_s13 = smov 0  }
   0x5   :  { %s1735_s14 = smov 0   ;;  %s1737_s15 = smov 0  }
   0x6   :  { %s1739_s16 = smov 0   ;;  %s1741_s17 = smov 0  }
   0x7 LB: > { %s1045_s18 = sadd.s32 4294967295, %s1700_s17   ;;  %s1046_s19 = sadd.s32 4294967294, %s1700_s17   ;;  %s1700_s17 = sphi %s1741_s17, %s20_s17   ;;  %s1696_s16 = sphi %s1739_s16, %s2241_s16   ;;  %s1692_s15 = sphi %s1737_s15, %s2240_s15   ;;  %s1688_s14 = sphi %s1735_s14, %s2239_s14   ;;  %s1684_s13 = sphi %s1733_s13, %s2238_s13   ;;  %s1680_s12 = sphi %s1731_s12, %s2237_s12  }
   0x8   : > { %p52_p0 = scmp.ne.s32.totalorder %s1684_s13, %s1680_s12  ;;  %p1765_p1 = scmp.eq.s32.totalorder %s1045_s18, 0 }
   0x9   : > { %p1769_p2 = scmp.eq.s32.totalorder %s1045_s18, 1  ;;  %p136_p3 = scmp.eq.s32.totalorder %s1046_s19, 1 }
   0xa   : > { %s2222_s20 = scalar_select %p1765_p1, 1, 0 }
   0xb   : > { %s2223_s21 = scalar_select %p1769_p2, 1, 0 }
   0xc   : > { %p1775_p4 = por %p1765_p1, %p52_p0  ;;  %p1047_p5 = scmp.ge.s32.totalorder %s1700_s17, 1 }
   0xd   : > { %p1780_p6 = por %p136_p3, %p52_p0  ;;  %p143_p7 = scmp.lt.s32.totalorder %s1700_s17, 3 }
   0xe   : > { %s2224_s22 = scalar_select %p1775_p4, 1, 0 }
   0xf   : > { %s2225_s23 = scalar_select %p1780_p6, 1, 0 }
  0x10   : > { %p1785_p8 = pnand %p1047_p5, %p143_p7  ;;  %s1702_s25 = smov [#allocation5]  }
  0x11   : > { %s157_s26 = sshll.u32 %s1702_s25, 4  ;;  %s32_s28 = sadd.s32 1, %s1696_s16  ;;  %s158_s26 = int_to_ptr.vmem [resolvable:$true] %s157_s26 }
  0x12   : > { %s2226_s24 = scalar_select %p1785_p8, 1, 0 }
  0x13   : > { %p1353_p9 = pneg %p1785_p8  ;;  %s1556_s4 = scalar_lea.hbm %s2215_s1, 512 }
  0x14   : > { %p1557_p12 = scmp.ne.s32.totalorder %s2215_s1, %s1556_s4  ;;  %p1563_p5 = scmp.lt.u32.totalorder %s1556_s4, %s2215_s1 }
  0x15   : > { %p1794_p11 = pnand %p1353_p9, %p1765_p1 }
  0x17   : > { %p1558_p13 = pneg %p1794_p11 }
  0x19   : > { %p1559_p0 = pnand %p1558_p13, %p1557_p12 }
  0x1b   : > { %p1560_p3 = pneg %p1559_p0 }
  0x1d   : > { %p1565_p7 = pnand %p1563_p5, %p1560_p3 }
  0x1f   : > { %1568 = shalt.err (!%p1565_p7)
}
  0x20   : > { %s1569_s9 = scalar_lea.vmem %s158_s26, 512  ;;  %p1577_p1 = scmp.lt.s32.totalorder %s158_s26, %s158_s26 }
  0x21   : > { %p1570_p9 = scmp.ne.s32.totalorder %s158_s26, %s1569_s9  ;;  %p1578_p4 = scmp.lt.s32.totalorder %s1569_s9, %s1569_s9 }
  0x23   : > { %p1572_p10 = pnand %p1570_p9, %p1558_p13  ;;  %p1579_p8 = por %p1578_p4, %p1577_p1 }
  0x25   : > { %p1573_p6 = pneg %p1572_p10 }
  0x27   : > { %p1580_p2 = pnand %p1579_p8, %p1573_p6 }
  0x29   : > { %1583 = shalt.err (!%p1580_p2)
}
  0x2a   : > { %s1703_s10 = smov 64   ;;  %s1704_s11 = smov 4  }
  0x2b   : > { %1356 = dma.hbm_to_vmem [thread:$0]  (!%p1794_p11), %s2215_s1, 512, %s158_s26, [#allocation6], %s1703_s10, %s1703_s10, %s1704_s11  }
  0x2c   : > { %p34_p1 = scmp.ge.s32.totalorder %s32_s28, 2  ;;  %s39_s25 = sadd.s32 1, %s1688_s14 }
  0x2d   : > { %p46_p2 = scmp.ne.s32.totalorder %s1688_s14, %s1684_s13  ;;  %p47_p4 = scmp.eq.s32.totalorder %s1700_s17, 0 }
  0x2e   : > { %s2243_s28 = smov (%p34_p1, %s32_s28), 0  ;;  %p2229_p8 = scmp.ne.s32.totalorder %s2223_s21, 0 }
  0x2f   : > { %p1821_p6 = por %p47_p4, %p46_p2  ;;  %s36_s27 = ssub.s32 %s1696_s16, %s2243_s28 }
  0x30   : > { %p1827_p10 = por %p2229_p8, %p46_p2  ;;  %p1366_p12 = scmp.lt.s32.totalorder %s1700_s17, 2 }
  0x31   : > { %p37_p11 = scmp.eq.s32.totalorder %s36_s27, 0  ;;  %s177_s26 = sand.u32 1, %s1688_s14  }
  0x32   : > { %s1051_s4 = sshll.u32 %s177_s26, 8  ;;  %s1148_s6 = sshll.u32 %s1696_s16, 12 }
  0x33   : > { %s1836_s5 = scalar_select %p37_p11, %s1688_s14, %s39_s25  }
  0x34   : > { %s1842_s9 = scalar_lea.hbm %s2214_s0, %s1148_s6  ;;  %s181_s21 = scalar_lea.vmem [#allocation2], %s1051_s4 }
  0x35   : > { %s188_s10 = sshll.u32 %s181_s21, 4  ;;  %p1848_p13 = pnand %p1366_p12, %p1821_p6  ;;  %s1844_s10 = int_to_ptr.vmem [resolvable:$true] %s188_s10 }
  0x36   : > { %s1852_s18 = scalar_lea.sflag [#allocation3], %s177_s26  ;;  %s1584_s19 = scalar_lea.hbm %s1842_s9, 4096 }
  0x37   : > { %p1585_p0 = scmp.ne.s32.totalorder %s1842_s9, %s1584_s19  ;;  %p1586_p3 = pneg %p1848_p13 }
  0x38   : > { %s1589_s29 = scalar_lea.hbm %s2214_s0, 8192  ;;  %p1590_p9 = scmp.lt.u32.totalorder %s1842_s9, %s2214_s0 }
  0x39   : > { %p1587_p5 = pnand %p1586_p3, %p1585_p0  ;;  %p1591_p1 = scmp.lt.u32.totalorder %s1589_s29, %s1584_s19 }
  0x3a   : > { %p1593_p4 = scmp.lt.u32.totalorder %s1584_s19, %s1842_s9 }
  0x3b   : > { %p1588_p7 = pneg %p1587_p5  ;;  %p1592_p2 = por %p1591_p1, %p1590_p9 }
  0x3d   : > { %p1594_p6 = por %p1593_p4, %p1592_p2 }
  0x3f   : > { %p1595_p8 = pnand %p1594_p6, %p1588_p7 }
  0x41   : > { %1598 = shalt.err (!%p1595_p8)
}
  0x42   : > { %s1599_s26 = scalar_lea.vmem %s1844_s10, 4096  ;;  %s1705_s7 = smov [#allocation2]  }
  0x43   : > { %p1600_p12 = scmp.ne.s32.totalorder %s1844_s10, %s1599_s26  ;;  %s1604_s8 = sshll.u32 %s1705_s7, 4  ;;  %s1605_s8 = int_to_ptr.vmem [resolvable:$false] %s1604_s8 }
  0x44   : > { %s1606_s21 = scalar_lea.vmem %s1605_s8, 8192  ;;  %p1607_p5 = scmp.lt.s32.totalorder %s1844_s10, %s1605_s8 }
  0x45   : > { %p1602_p11 = pnand %p1600_p12, %p1586_p3  ;;  %p1608_p9 = scmp.lt.s32.totalorder %s1606_s21, %s1599_s26 }
  0x47   : > { %p1603_p0 = pneg %p1602_p11  ;;  %p1609_p1 = por %p1608_p9, %p1607_p5 }
  0x49   : > { %p1610_p2 = pnand %p1609_p1, %p1603_p0 }
  0x4b   : > { %1613 = shalt.err (!%p1610_p2)
}
  0x4c   : > { %s1706_s19 = smov 128   ;;  %s1707_s25 = smov 8  }
  0x4d   : > { %1360 = dma.hbm_to_vmem [thread:$0]  (!%p1848_p13), %s1842_s9, 4096, %s1844_s10, %s1852_s18, %s1706_s19, %s1706_s19, %s1707_s25  }
  0x4e   : > { %p2232_p3 = scmp.ne.s32.totalorder %s2226_s24, 0 }
  0x4f   : > { %s1883_s27 = sand.u32 (!%p2232_p3), 1, %s1684_s13   ;;  %p2233_p7 = scmp.ne.s32.totalorder (!%p2232_p3), %s2224_s22, 0 }
  0x50   : > { %200 = sbr.rel (%p2232_p3) target bundleno = 424 (0x1a8), region = 32  ;;  %s1055_s29 = sshll.u32 (!%p2232_p3), %s1883_s27, 8 }
  0x51   : > { %s203_s4 = scalar_lea.sflag (!%p2232_p3), [#allocation3], %s1883_s27  ;;  %s1887_s6 = scalar_lea.vmem (!%p2232_p3), [#allocation2], %s1055_s29 }
  0x57   : > { %1667 = dma.done.wait (%p2233_p7), %s203_s4, 4096  }
  0x58   : > { %1669 = vsyncadd (%p2233_p7), %s203_s4, 4294963200  ;;  %p2234_p13 = scmp.ne.s32.totalorder %s2222_s20, 0 }
  0x5a   : > { %1671 = dma.done.wait (%p2234_p13), [#allocation6], 512  }
  0x5b   : > { %1673 = vsyncadd (%p2234_p13), [#allocation6], 4294966784  ;;  %v1424_v0 = vld [vmem:[#allocation5] sm:$0xff]   ;;  %v1425_v1 = vld [vmem:[#allocation5 + $0x8] sm:$0xff]   ;;  %vm329_vm0 = vcmask 523264   ;;  %s1057_s24 = sshll.u32 %s1883_s27, 7 }
  0x5c   : > { %1297 = vmatprep.subr.bf16.mxu0 %v1424_v0  ;;  %1337 = vmatprep.subr.bf16.mxu1 %v1424_v0  ;;  %v1426_v2 = vld [vmem:[#allocation5 + $0x10] sm:$0xff]   ;;  %v242_v3 = vld [vmem:[%s1887_s6] sm:$0xff]  ;;  %v243_v4 = vld [vmem:[%s1887_s6 + $0x8] sm:$0xff]  ;;  %s2076_s9 = scalar_lea.vmem [#allocation7], %s1057_s24  ;;  %s1181_s10 = sshll.u32 %s1692_s15, 11 }
  0x5d   : > { %1298 = vmatpush3.bf16.msra.mxu0 %v1424_v0  ;;  %1341 = vmatpush3.bf16.msra.mxu1 %v1424_v0  ;;  %v258_v5 = vld [vmem:[%s1887_s6 + $0x80] sm:$0xff]  ;;  %v274_v6 = vpack.c.bf16 %v243_v4, %v242_v3  ;;  %v259_v7 = vld [vmem:[%s1887_s6 + $0x88] sm:$0xff]  ;;  %v1427_v9 = vld [vmem:[#allocation5 + $0x18] sm:$0xff]   ;;  %s938_s11 = sshll.u32 %s2076_s9, 4  ;;  %s2160_s15 = scalar_lea.hbm %s2217_s3, %s1181_s10  ;;  %s2162_s11 = int_to_ptr.vmem [resolvable:$true] %s938_s11 }
  0x5e   : > { %1299 = vmatprep.subr.bf16.mxu0 %v1425_v1  ;;  %1338 = vmatprep.subr.bf16.mxu1 %v1425_v1  ;;  %v282_v8 = vpack.c.bf16 %v259_v7, %v258_v5  ;;  %v244_v10 = vld [vmem:[%s1887_s6 + $0x10] sm:$0xff]  ;;  %v245_v11 = vld [vmem:[%s1887_s6 + $0x18] sm:$0xff]  ;;  %v246_v14 = vld [vmem:[%s1887_s6 + $0x20] sm:$0xff]  ;;  %s924_s7 = scalar_lea.sflag [#allocation4], %s1883_s27  ;;  %s1614_s8 = scalar_lea.vmem %s2162_s11, 2048 }
  0x5f   : > { %1305 = vmatprep.mubr.msk.bf16.mxu0 %vm329_vm0, %v274_v6  ;;  %v260_v12 = vld [vmem:[%s1887_s6 + $0x90] sm:$0xff]  ;;  %v261_v13 = vld [vmem:[%s1887_s6 + $0x98] sm:$0xff]  ;;  %v247_v15 = vld [vmem:[%s1887_s6 + $0x28] sm:$0xff]  ;;  %v275_v18 = vpack.c.bf16 %v245_v11, %v244_v10  ;;  %p1615_p4 = scmp.ne.s32.totalorder %s2162_s11, %s1614_s8  ;;  %s1708_s21 = smov [#allocation7]  }
  0x60   : > { %1321 = vmatprep.mubr.msk.bf16.mxu1 %vm329_vm0, %v282_v8  ;;  %v262_v16 = vld [vmem:[%s1887_s6 + $0xa0] sm:$0xff]  ;;  %v263_v17 = vld [vmem:[%s1887_s6 + $0xa8] sm:$0xff]  ;;  %v283_v19 = vpack.c.bf16 %v261_v13, %v260_v12  ;;  %v276_v20 = vpack.c.bf16 %v247_v15, %v246_v14  ;;  %v248_v22 = vld [vmem:[%s1887_s6 + $0x30] sm:$0xff]  ;;  %s1618_s19 = sshll.u32 %s1708_s21, 4  ;;  %s1619_s19 = int_to_ptr.vmem [resolvable:$false] %s1618_s19 }
  0x61   : > { %1300 = vmatpush3.bf16.msra.mxu0 %v1425_v1  ;;  %1342 = vmatpush3.bf16.msra.mxu1 %v1425_v1  ;;  %v284_v21 = vpack.c.bf16 %v263_v17, %v262_v16  ;;  %v249_v23 = vld [vmem:[%s1887_s6 + $0x38] sm:$0xff]  ;;  %v264_v24 = vld [vmem:[%s1887_s6 + $0xb0] sm:$0xff]  ;;  %v250_v26 = vld [vmem:[%s1887_s6 + $0x40] sm:$0xff]  ;;  %p1616_p6 = pnand %p1615_p4, %p1827_p10  ;;  %s1620_s25 = scalar_lea.vmem %s1619_s19, 4096 }
  0x62   : > { %1301 = vmatprep.subr.bf16.mxu0 %v1426_v2  ;;  %1339 = vmatprep.subr.bf16.mxu1 %v1426_v2  ;;  %v265_v25 = vld [vmem:[%s1887_s6 + $0xb8] sm:$0xff]  ;;  %v251_v27 = vld [vmem:[%s1887_s6 + $0x48] sm:$0xff]  ;;  %v266_v28 = vld [vmem:[%s1887_s6 + $0xc0] sm:$0xff]  ;;  %v277_v30 = vpack.c.bf16 %v249_v23, %v248_v22  ;;  %p1621_p12 = scmp.lt.s32.totalorder %s2162_s11, %s1619_s19  ;;  %p1622_p11 = scmp.lt.s32.totalorder %s1620_s25, %s1614_s8 }
  0x63   : > { %v267_v29 = vld [vmem:[%s1887_s6 + $0xc8] sm:$0xff]  ;;  %v285_v31 = vpack.c.bf16 %v265_v25, %v264_v24  ;;  %v278_v32 = vpack.c.bf16 %v251_v27, %v250_v26  ;;  %v252_v34 = vld [vmem:[%s1887_s6 + $0x50] sm:$0xff]  ;;  %v253_v35 = vld [vmem:[%s1887_s6 + $0x58] sm:$0xff]  ;;  %p1617_p8 = pneg %p1616_p6 }
  0x64   : > { %v286_v33 = vpack.c.bf16 %v267_v29, %v266_v28  ;;  %v268_v36 = vld [vmem:[%s1887_s6 + $0xd0] sm:$0xff]  ;;  %v269_v37 = vld [vmem:[%s1887_s6 + $0xd8] sm:$0xff]  ;;  %v254_v38 = vld [vmem:[%s1887_s6 + $0x60] sm:$0xff]  ;;  %v279_v42 = vpack.c.bf16 %v253_v35, %v252_v34  ;;  %p1623_p0 = por %p1622_p11, %p1621_p12 }
  0x65   : > { %1302 = vmatpush3.bf16.msra.mxu0 %v1426_v2  ;;  %1343 = vmatpush3.bf16.msra.mxu1 %v1426_v2  ;;  %v255_v39 = vld [vmem:[%s1887_s6 + $0x68] sm:$0xff]  ;;  %v270_v40 = vld [vmem:[%s1887_s6 + $0xe0] sm:$0xff]  ;;  %v287_v43 = vpack.c.bf16 %v269_v37, %v268_v36  ;;  %v256_v46 = vld [vmem:[%s1887_s6 + $0x70] sm:$0xff] }
  0x66   : > { %1303 = vmatprep.subr.bf16.mxu0 %v1427_v9  ;;  %1340 = vmatprep.subr.bf16.mxu1 %v1427_v9  ;;  %v271_v41 = vld [vmem:[%s1887_s6 + $0xe8] sm:$0xff]  ;;  %v280_v44 = vpack.c.bf16 %v255_v39, %v254_v38  ;;  %v257_v47 = vld [vmem:[%s1887_s6 + $0x78] sm:$0xff]  ;;  %v272_v48 = vld [vmem:[%s1887_s6 + $0xf0] sm:$0xff]  ;;  %p1624_p5 = pnand %p1623_p0, %p1617_p8 }
  0x67   : > { %v288_v45 = vpack.c.bf16 %v271_v41, %v270_v40  ;;  %v273_v49 = vld [vmem:[%s1887_s6 + $0xf8] sm:$0xff]  ;;  %v281_v50 = vpack.c.bf16 %v257_v47, %v256_v46  ;;  %v1948_v52 = vld [vmem:[%s2216_s2] ss:$0 sm:$0xff] }
  0x68   : > { %v289_v51 = vpack.c.bf16 %v273_v49, %v272_v48 }
  0x69   : > { %1304 = vmatpush3.bf16.msra.mxu0 %v1427_v9  ;;  %1344 = vmatpush3.bf16.msra.mxu1 %v1427_v9 }
  0x6c   : > { %1306 = vmatmul.mubr.msk.bf16.vlgmr.msra.gmra.mrb[0].mxu0 %vm329_vm0, %v275_v18  ;;  %1322 = vmatmul.mubr.msk.bf16.vlgmr.msra.gmra.mrb[0].mxu1 %vm329_vm0, %v283_v19 }
  0x6d   : > { %1309 = vmatprep.mubr.msk.bf16.mxu0 %vm329_vm0, %v276_v20  ;;  %1325 = vmatprep.mubr.msk.bf16.mxu1 %vm329_vm0, %v284_v21 }
  0x74   : > { %1310 = vmatmul.mubr.msk.bf16.gmra.mrb[4].mxu0 %vm329_vm0, %v277_v30  ;;  %1326 = vmatmul.mubr.msk.bf16.gmra.mrb[4].mxu1 %vm329_vm0, %v285_v31 }
  0x75   : > { %1313 = vmatprep.mubr.msk.bf16.mxu0 %vm329_vm0, %v278_v32  ;;  %1329 = vmatprep.mubr.msk.bf16.mxu1 %vm329_vm0, %v286_v33 }
  0x7c   : > { %1314 = vmatmul.mubr.msk.bf16.gmra.mrb[8].mxu0 %vm329_vm0, %v279_v42  ;;  %1330 = vmatmul.mubr.msk.bf16.gmra.mrb[8].mxu1 %vm329_vm0, %v287_v43 }
  0x7d   : > { %1317 = vmatprep.mubr.msk.bf16.mxu0 %vm329_vm0, %v280_v44  ;;  %1333 = vmatprep.mubr.msk.bf16.mxu1 %vm329_vm0, %v288_v45 }
  0x84   : > { %1318 = vmatmul.mubr.msk.bf16.gmra.mrb[12].mxu0 %vm329_vm0, %v281_v50  ;;  %1334 = vmatmul.mubr.msk.bf16.gmra.mrb[12].mxu1 %vm329_vm0, %v289_v51 }
 0x13f   : > { %v1307_v53 = vpop.f32.mrb[0].mxu0  ;;  %v1323_v54 = vpop.f32.mrb[0].mxu1 }
 0x140   : > { %v1951_v55 = vadd.f32 %v1307_v53, %v1948_v52  ;;  %v1954_v56 = vadd.f32 %v1323_v54, %v1948_v52  ;;  %v412_v57 = vpop.f32.mrb[1].mxu0  ;;  %v476_v58 = vpop.f32.mrb[1].mxu1 }
 0x141   : > { %v1957_v59 = vadd.f32 %v1948_v52, %v412_v57  ;;  %v1960_v60 = vadd.f32 %v1948_v52, %v476_v58  ;;  %v1308_v61 = vpop.f32.mrb[2].mxu0  ;;  %v1324_v62 = vpop.f32.mrb[2].mxu1 }
 0x142   : > { %v1081_v63 = vmul.f32 -1.442695, %v1951_v55  ;;  %v1097_v0 = vmul.f32 -1.442695, %v1954_v56  ;;  %v1965_v1 = vadd.f32 %v1308_v61, %v1948_v52  ;;  %v1968_v2 = vadd.f32 %v1324_v62, %v1948_v52  ;;  %v415_v3 = vpop.f32.mrb[3].mxu0  ;;  %v479_v4 = vpop.f32.mrb[3].mxu1 }
 0x143   : > { %v1079_v5 = vmul.f32 -1.442695, %v1957_v59  ;;  %v1095_v6 = vmul.f32 -1.442695, %v1960_v60  ;;  %v1973_v7 = vadd.f32 %v1948_v52, %v415_v3  ;;  %v1976_v8 = vadd.f32 %v1948_v52, %v479_v4 }
 0x144   : > { %1428 = vpow2.f32 %v1081_v63  ;;  %v1082_v9 = vmul.f32 -1.442695, %v1965_v1  ;;  %v1098_v10 = vmul.f32 -1.442695, %v1968_v2 }
 0x145   : > { %1430 = vpow2.f32 %v1097_v0  ;;  %v1080_v11 = vmul.f32 -1.442695, %v1973_v7  ;;  %v1096_v12 = vmul.f32 -1.442695, %v1976_v8 }
 0x146   : > { %1432 = vpow2.f32 %v1079_v5 }
 0x147   : > { %1434 = vpow2.f32 %v1095_v6  ;;  %v1311_v13 = vpop.f32.mrb[4].mxu0  ;;  %v1327_v14 = vpop.f32.mrb[4].mxu1 }
 0x148   : > { %1436 = vpow2.f32 %v1082_v9  ;;  %v1983_v15 = vadd.f32 %v1311_v13, %v1948_v52  ;;  %v1986_v16 = vadd.f32 %v1327_v14, %v1948_v52  ;;  %v428_v17 = vpop.f32.mrb[5].mxu0  ;;  %v492_v18 = vpop.f32.mrb[5].mxu1 }
 0x149   : > { %1438 = vpow2.f32 %v1098_v10  ;;  %v1989_v19 = vadd.f32 %v1948_v52, %v428_v17  ;;  %v1992_v20 = vadd.f32 %v1948_v52, %v492_v18  ;;  %v1312_v21 = vpop.f32.mrb[6].mxu0  ;;  %v1328_v22 = vpop.f32.mrb[6].mxu1 }
 0x14a   : > { %1440 = vpow2.f32 %v1080_v11  ;;  %v1085_v23 = vmul.f32 -1.442695, %v1983_v15  ;;  %v1101_v24 = vmul.f32 -1.442695, %v1986_v16  ;;  %v1997_v25 = vadd.f32 %v1312_v21, %v1948_v52  ;;  %v431_v26 = vpop.f32.mrb[7].mxu0  ;;  %v495_v27 = vpop.f32.mrb[7].mxu1 }
 0x14b   : > { %1442 = vpow2.f32 %v1096_v12  ;;  %v1083_v28 = vmul.f32 -1.442695, %v1989_v19  ;;  %v1099_v29 = vmul.f32 -1.442695, %v1992_v20  ;;  %v2003_v49 = vadd.f32 %v1328_v22, %v1948_v52 }
 0x14c   : > { %1444 = vpow2.f32 %v1085_v23  ;;  %v1086_v30 = vmul.f32 -1.442695, %v1997_v25  ;;  %v2006_v54 = vadd.f32 %v1948_v52, %v431_v26  ;;  %v2010_v4 = vadd.f32 %v1948_v52, %v495_v27 }
 0x14d   : > { %1446 = vpow2.f32 %v1101_v24  ;;  %v1102_v3 = vmul.f32 -1.442695, %v2003_v49 }
 0x14e   : > { %v1429_v31 = vpop.eup %1428  ;;  %1448 = vpow2.f32 %v1083_v28  ;;  %v1084_v10 = vmul.f32 -1.442695, %v2006_v54 }
 0x14f   : > { %v1431_v32 = vpop.eup %1430  ;;  %v637_v33 = vadd.f32 1.0, %v1429_v31  ;;  %1450 = vpow2.f32 %v1099_v29  ;;  %v1315_v34 = vpop.f32.mrb[8].mxu0 }
 0x150   : > { %v1331_v35 = vpop.f32.mrb[8].mxu1  ;;  %v1433_v36 = vpop.eup %1432  ;;  %v653_v37 = vadd.f32 1.0, %v1431_v32  ;;  %1452 = vpow2.f32 %v1086_v30  ;;  %v2014_v11 = vadd.f32 %v1315_v34, %v1948_v52 }
 0x151   : > { %v444_v38 = vpop.f32.mrb[9].mxu0  ;;  %v508_v39 = vpop.f32.mrb[9].mxu1  ;;  %1454 = vrcp.f32 %v637_v33  ;;  %v635_v41 = vadd.f32 1.0, %v1433_v36  ;;  %v2019_v18 = vadd.f32 %v1331_v35, %v1948_v52 }
 0x152   : > { %v1435_v40 = vpop.eup %1434  ;;  %v1316_v42 = vpop.f32.mrb[10].mxu0  ;;  %1456 = vrcp.f32 %v653_v37  ;;  %v2022_v21 = vadd.f32 %v1948_v52, %v444_v38  ;;  %v2029_v27 = vadd.f32 %v1948_v52, %v508_v39  ;;  %v1100_v37 = vmul.f32 -1.442695, %v2010_v4 }
 0x153   : > { %v1332_v43 = vpop.f32.mrb[10].mxu1  ;;  %v1437_v44 = vpop.eup %1436  ;;  %v651_v45 = vadd.f32 1.0, %v1435_v40  ;;  %1458 = vrcp.f32 %v635_v41  ;;  %v2032_v28 = vadd.f32 %v1316_v42, %v1948_v52  ;;  %v1089_v39 = vmul.f32 -1.442695, %v2014_v11 }
 0x154   : > { %v447_v46 = vpop.f32.mrb[11].mxu0  ;;  %v1439_v47 = vpop.eup %1438  ;;  %v638_v48 = vadd.f32 1.0, %v1437_v44  ;;  %v2039_v33 = vadd.f32 %v1332_v43, %v1948_v52  ;;  %v1105_v40 = vmul.f32 -1.442695, %v2019_v18  ;;  %v1087_v42 = vmul.f32 -1.442695, %v2022_v21 }
 0x155   : > { %v511_v50 = vpop.f32.mrb[11].mxu1  ;;  %v1441_v51 = vpop.eup %1440  ;;  %1460 = vrcp.f32 %v651_v45  ;;  %v654_v53 = vadd.f32 1.0, %v1439_v47  ;;  %v2042_v34 = vadd.f32 %v1948_v52, %v447_v46  ;;  %v1103_v43 = vmul.f32 -1.442695, %v2029_v27 }
 0x156   : > { %v1443_v57 = vpop.eup %1442  ;;  %1462 = vrcp.f32 %v638_v48  ;;  %v636_v58 = vadd.f32 1.0, %v1441_v51  ;;  %v2053_v44 = vadd.f32 %v1948_v52, %v511_v50  ;;  %v1090_v46 = vmul.f32 -1.442695, %v2032_v28 }
 0x157   : > { %v1445_v61 = vpop.eup %1444  ;;  %1464 = vrcp.f32 %v654_v53  ;;  %v652_v62 = vadd.f32 1.0, %v1443_v57  ;;  %v1319_v5 = vpop.f32.mrb[12].mxu0  ;;  %v1106_v47 = vmul.f32 -1.442695, %v2039_v33  ;;  %v1088_v48 = vmul.f32 -1.442695, %v2042_v34 }
 0x158   : > { %v1447_v63 = vpop.eup %1446  ;;  %1466 = vrcp.f32 %v636_v58  ;;  %v641_v0 = vadd.f32 1.0, %v1445_v61  ;;  %v1335_v12 = vpop.f32.mrb[12].mxu1  ;;  %v2061_v58 = vadd.f32 %v1319_v5, %v1948_v52 }
 0x159   : > { %v1449_v6 = vpop.eup %1448  ;;  %1468 = vrcp.f32 %v652_v62  ;;  %v657_v9 = vadd.f32 1.0, %v1447_v63  ;;  %v2016_v13 = vpop.f32.mrb[13].mxu0  ;;  %v2066_v63 = vadd.f32 %v1335_v12, %v1948_v52 }
 0x15a   : > { %v1451_v14 = vpop.eup %1450  ;;  %1470 = vrcp.f32 %v641_v0  ;;  %v639_v17 = vadd.f32 1.0, %v1449_v6  ;;  %v2024_v22 = vpop.f32.mrb[13].mxu1 }
 0x15b   : > { %v2026_v23 = vpop.f32.mrb[14].mxu0  ;;  %v1453_v24 = vpop.eup %1452  ;;  %1472 = vrcp.f32 %v657_v9  ;;  %v655_v26 = vadd.f32 1.0, %v1451_v14  ;;  %v1109_v14 = vmul.f32 -1.442695, %v2066_v63 }
 0x15c   : > { %v2034_v29 = vpop.f32.mrb[14].mxu1  ;;  %v2036_v30 = vpop.f32.mrb[15].mxu0  ;;  %1474 = vrcp.f32 %v639_v17  ;;  %v642_v32 = vadd.f32 1.0, %v1453_v24 }
 0x15d   : > { %v1455_v31 = vpop.eup %1454  ;;  %v2044_v35 = vpop.f32.mrb[15].mxu1  ;;  %1476 = vrcp.f32 %v655_v26 }
 0x15e   : > { %v1457_v36 = vpop.eup %1456  ;;  %1478 = vrcp.f32 %v642_v32  ;;  %v733_v53 = vmul.f32 %v1455_v31, %v1951_v55 }
 0x15f   : > { %v1459_v38 = vpop.eup %1458  ;;  %1480 = vpow2.f32 %v1102_v3  ;;  %v749_v50 = vmul.f32 %v1457_v36, %v1954_v56 }
 0x160   : > { %v1461_v41 = vpop.eup %1460  ;;  %1482 = vpow2.f32 %v1084_v10  ;;  %v731_v3 = vmul.f32 %v1459_v38, %v1957_v59 }
 0x161   : > { %v1463_v45 = vpop.eup %1462  ;;  %1484 = vpow2.f32 %v1100_v37  ;;  %v747_v5 = vmul.f32 %v1461_v41, %v1960_v60 }
 0x162   : > { %v1465_v51 = vpop.eup %1464  ;;  %v734_v57 = vmul.f32 %v1463_v45, %v1965_v1  ;;  %1486 = vpow2.f32 %v1089_v39 }
 0x163   : > { %v1467_v61 = vpop.eup %1466  ;;  %v750_v62 = vmul.f32 %v1465_v51, %v1968_v2  ;;  %1488 = vpow2.f32 %v1105_v40  ;;  %v1104_v2 = vmul.f32 -1.442695, %v2053_v44 }
 0x164   : > { %v1469_v0 = vpop.eup %1468  ;;  %v1190_v55 = vpack.c.bf16 %v734_v57, %v733_v53  ;;  %v732_v1 = vmul.f32 %v1467_v61, %v1973_v7  ;;  %1490 = vpow2.f32 %v1087_v42  ;;  %v2094_v57 = vadd.f32 %v1948_v52, %v2016_v13 }
 0x165   : > { %v1471_v6 = vpop.eup %1470  ;;  %v1230_v9 = vpack.c.bf16 %v750_v62, %v749_v50  ;;  %v748_v10 = vmul.f32 %v1469_v0, %v1976_v8  ;;  %1492 = vpow2.f32 %v1103_v43  ;;  %v1093_v8 = vmul.f32 -1.442695, %v2061_v58 }
 0x166   : > { %v2072_v56 = vpop.eup %1472  ;;  %1262 = vst [vmem:[%s2076_s9 + $0x8] sm:$0xff] %v1190_v55   ;;  %v1185_v59 = vpack.c.bf16 %v732_v1, %v731_v3  ;;  %1494 = vpow2.f32 %v1090_v46  ;;  %v737_v26 = vmul.f32 %v1471_v6, %v1983_v15  ;;  %v2098_v62 = vadd.f32 %v1948_v52, %v2024_v22 }
 0x167   : > { %v2080_v7 = vpop.eup %1474  ;;  %1270 = vst [vmem:[%s2076_s9 + $0x48] sm:$0xff] %v1230_v9   ;;  %v1225_v60 = vpack.c.bf16 %v748_v10, %v747_v5  ;;  %1496 = vpow2.f32 %v1106_v47  ;;  %v2102_v55 = vadd.f32 %v2026_v23, %v1948_v52  ;;  %v2106_v13 = vadd.f32 %v2034_v29, %v1948_v52 }
 0x168   : > { %v2084_v12 = vpop.eup %1476  ;;  %1186 = vst [vmem:[%s2076_s9] sm:$0xff] %v1185_v59   ;;  %1498 = vpow2.f32 %v1088_v48  ;;  %v2110_v5 = vadd.f32 %v1948_v52, %v2036_v30  ;;  %v1091_v9 = vmul.f32 -1.442695, %v2094_v57  ;;  %v1107_v23 = vmul.f32 -1.442695, %v2098_v62 }
 0x169   : > { %v1479_v17 = vpop.eup %1478  ;;  %1269 = vst [vmem:[%s2076_s9 + $0x40] sm:$0xff] %v1225_v60   ;;  %1500 = vpow2.f32 %v1104_v2  ;;  %v2116_v59 = vadd.f32 %v1948_v52, %v2044_v35  ;;  %v753_v29 = vmul.f32 %v2072_v56, %v1986_v16  ;;  %v1094_v30 = vmul.f32 -1.442695, %v2102_v55 }
 0x16a   : > { %v1481_v24 = vpop.eup %1480  ;;  %v738_v31 = vmul.f32 %v1479_v17, %v1997_v25  ;;  %1502 = vpow2.f32 %v1093_v8  ;;  %v1092_v52 = vmul.f32 -1.442695, %v2110_v5  ;;  %v751_v16 = vmul.f32 %v2084_v12, %v1992_v20 }
 0x16b   : > { %v1483_v32 = vpop.eup %1482  ;;  %v658_v36 = vadd.f32 1.0, %v1481_v24  ;;  %1504 = vpow2.f32 %v1109_v14  ;;  %v735_v14 = vmul.f32 %v2080_v7, %v1989_v19  ;;  %v1110_v24 = vmul.f32 -1.442695, %v2106_v13 }
 0x16c   : > { %v1485_v37 = vpop.eup %1484  ;;  %v1200_v38 = vpack.c.bf16 %v738_v31, %v737_v26  ;;  %v640_v39 = vadd.f32 1.0, %v1483_v32  ;;  %v1108_v19 = vmul.f32 -1.442695, %v2116_v59 }
 0x16d   : > { %v1487_v40 = vpop.eup %1486  ;;  %1506 = vrcp.f32 %v658_v36  ;;  %v656_v41 = vadd.f32 1.0, %v1485_v37 }
 0x16e   : > { %v1489_v42 = vpop.eup %1488  ;;  %1264 = vst [vmem:[%s2076_s9 + $0x18] sm:$0xff] %v1200_v38   ;;  %1508 = vrcp.f32 %v640_v39  ;;  %v645_v43 = vadd.f32 1.0, %v1487_v40 }
 0x16f   : > { %v1491_v45 = vpop.eup %1490  ;;  %1510 = vrcp.f32 %v656_v41  ;;  %v661_v15 = vadd.f32 1.0, %v1489_v42 }
 0x170   : > { %v1493_v46 = vpop.eup %1492  ;;  %1512 = vrcp.f32 %v645_v43  ;;  %v643_v25 = vadd.f32 1.0, %v1491_v45 }
 0x171   : > { %v1495_v47 = vpop.eup %1494  ;;  %1514 = vrcp.f32 %v661_v15  ;;  %v659_v48 = vadd.f32 1.0, %v1493_v46 }
 0x172   : > { %v1497_v51 = vpop.eup %1496  ;;  %1516 = vrcp.f32 %v643_v25  ;;  %v646_v53 = vadd.f32 1.0, %v1495_v47 }
 0x173   : > { %v1499_v61 = vpop.eup %1498  ;;  %1518 = vrcp.f32 %v659_v48  ;;  %v662_v50 = vadd.f32 1.0, %v1497_v51 }
 0x174   : > { %v1501_v0 = vpop.eup %1500  ;;  %1520 = vrcp.f32 %v646_v53  ;;  %v644_v3 = vadd.f32 1.0, %v1499_v61 }
 0x175   : > { %v1503_v1 = vpop.eup %1502  ;;  %1522 = vrcp.f32 %v662_v50  ;;  %v660_v6 = vadd.f32 1.0, %v1501_v0 }
 0x176   : > { %v1505_v22 = vpop.eup %1504  ;;  %1524 = vrcp.f32 %v644_v3  ;;  %v649_v45 = vadd.f32 1.0, %v1503_v1 }
 0x177   : > { %v1507_v10 = vpop.eup %1506  ;;  %1526 = vrcp.f32 %v660_v6  ;;  %v665_v46 = vadd.f32 1.0, %v1505_v22 }
 0x178   : > { %v1509_v2 = vpop.eup %1508  ;;  %v754_v60 = vmul.f32 %v1507_v10, %v2003_v49  ;;  %1528 = vpow2.f32 %v1091_v9 }
 0x179   : > { %v1511_v8 = vpop.eup %1510  ;;  %v736_v17 = vmul.f32 %v1509_v2, %v2006_v54  ;;  %1530 = vpow2.f32 %v1107_v23 }
 0x17a   : > { %v1513_v35 = vpop.eup %1512  ;;  %v1240_v49 = vpack.c.bf16 %v754_v60, %v753_v29  ;;  %v752_v56 = vmul.f32 %v1511_v8, %v2010_v4  ;;  %1532 = vpow2.f32 %v1094_v30 }
 0x17b   : > { %v1515_v26 = vpop.eup %1514  ;;  %v1195_v31 = vpack.c.bf16 %v736_v17, %v735_v14  ;;  %1534 = vpow2.f32 %v1110_v24  ;;  %v741_v4 = vmul.f32 %v1513_v35, %v2014_v11 }
 0x17c   : > { %v1517_v54 = vpop.eup %1516  ;;  %1272 = vst [vmem:[%s2076_s9 + $0x58] sm:$0xff] %v1240_v49   ;;  %v1235_v7 = vpack.c.bf16 %v752_v56, %v751_v16  ;;  %1536 = vpow2.f32 %v1092_v52  ;;  %v757_v38 = vmul.f32 %v1515_v26, %v2019_v18 }
 0x17d   : > { %v1519_v32 = vpop.eup %1518  ;;  %1263 = vst [vmem:[%s2076_s9 + $0x10] sm:$0xff] %v1195_v31   ;;  %1538 = vpow2.f32 %v1108_v19  ;;  %v739_v41 = vmul.f32 %v1517_v54, %v2022_v21 }
 0x17e   : > { %v1521_v36 = vpop.eup %1520  ;;  %1271 = vst [vmem:[%s2076_s9 + $0x50] sm:$0xff] %v1235_v7   ;;  %v755_v11 = vmul.f32 %v1519_v32, %v2029_v27  ;;  %1540 = vrcp.f32 %v649_v45 }
 0x17f   : > { %v1523_v20 = vpop.eup %1522  ;;  %v742_v12 = vmul.f32 %v1521_v36, %v2032_v28  ;;  %1542 = vrcp.f32 %v665_v46 }
 0x180   : > { %v1525_v37 = vpop.eup %1524  ;;  %v758_v39 = vmul.f32 %v1523_v20, %v2039_v33 }
 0x181   : > { %v1527_v40 = vpop.eup %1526  ;;  %v1210_v42 = vpack.c.bf16 %v742_v12, %v741_v4  ;;  %v740_v43 = vmul.f32 %v1525_v37, %v2042_v34 }
 0x182   : > { %v1250_v15 = vpack.c.bf16 %v758_v39, %v757_v38  ;;  %v756_v28 = vmul.f32 %v1527_v40, %v2053_v44  ;;  %v1529_v18 = vpop.eup %1528 }
 0x183   : > { %1266 = vst [vmem:[%s2076_s9 + $0x28] sm:$0xff] %v1210_v42   ;;  %v1205_v25 = vpack.c.bf16 %v740_v43, %v739_v41  ;;  %v1531_v47 = vpop.eup %1530  ;;  %v647_v21 = vadd.f32 1.0, %v1529_v18 }
 0x184   : > { %1274 = vst [vmem:[%s2076_s9 + $0x68] sm:$0xff] %v1250_v15   ;;  %v1245_v33 = vpack.c.bf16 %v756_v28, %v755_v11  ;;  %v1533_v48 = vpop.eup %1532  ;;  %v663_v34 = vadd.f32 1.0, %v1531_v47 }
 0x185   : > { %1265 = vst [vmem:[%s2076_s9 + $0x20] sm:$0xff] %v1205_v25   ;;  %v1535_v51 = vpop.eup %1534  ;;  %1544 = vrcp.f32 %v647_v21  ;;  %v650_v27 = vadd.f32 1.0, %v1533_v48 }
 0x186   : > { %1273 = vst [vmem:[%s2076_s9 + $0x60] sm:$0xff] %v1245_v33   ;;  %v1537_v53 = vpop.eup %1536  ;;  %1546 = vrcp.f32 %v663_v34  ;;  %v666_v44 = vadd.f32 1.0, %v1535_v51 }
 0x187   : > { %v1539_v61 = vpop.eup %1538  ;;  %1548 = vrcp.f32 %v650_v27  ;;  %v648_v50 = vadd.f32 1.0, %v1537_v53 }
 0x188   : > { %1550 = vrcp.f32 %v666_v44  ;;  %v664_v0 = vadd.f32 1.0, %v1539_v61  ;;  %v1541_v3 = vpop.eup %1540 }
 0x189   : > { %1552 = vrcp.f32 %v648_v50  ;;  %v1543_v1 = vpop.eup %1542  ;;  %v745_v23 = vmul.f32 %v1541_v3, %v2061_v58 }
 0x18a   : > { %1554 = vrcp.f32 %v664_v0  ;;  %v761_v60 = vmul.f32 %v1543_v1, %v2066_v63 }
 0x18f   : > { %v1545_v6 = vpop.eup %1544 }
 0x190   : > { %v1547_v22 = vpop.eup %1546  ;;  %v743_v14 = vmul.f32 %v1545_v6, %v2094_v57 }
 0x191   : > { %v1549_v9 = vpop.eup %1548 }
 0x192   : > { %v1551_v10 = vpop.eup %1550  ;;  %v746_v2 = vmul.f32 %v1549_v9, %v2102_v55  ;;  %v759_v55 = vmul.f32 %v1547_v22, %v2098_v62 }
 0x193   : > { %v1553_v29 = vpop.eup %1552  ;;  %v762_v30 = vmul.f32 %v1551_v10, %v2106_v13 }
 0x194   : > { %v1555_v8 = vpop.eup %1554  ;;  %v1220_v17 = vpack.c.bf16 %v746_v2, %v745_v23  ;;  %v744_v58 = vmul.f32 %v1553_v29, %v2110_v5 }
 0x195   : > { %v1260_v24 = vpack.c.bf16 %v762_v30, %v761_v60  ;;  %v760_v52 = vmul.f32 %v1555_v8, %v2116_v59 }
 0x196   : > { %1268 = vst [vmem:[%s2076_s9 + $0x38] sm:$0xff] %v1220_v17   ;;  %v1215_v63 = vpack.c.bf16 %v744_v58, %v743_v14 }
 0x197   : > { %1276 = vst [vmem:[%s2076_s9 + $0x78] sm:$0xff] %v1260_v24   ;;  %v1255_v57 = vpack.c.bf16 %v760_v52, %v759_v55 }
 0x198   : > { %1267 = vst [vmem:[%s2076_s9 + $0x30] sm:$0xff] %v1215_v63  }
 0x199   : > { %1275 = vst [vmem:[%s2076_s9 + $0x70] sm:$0xff] %v1255_v57  }
 0x19a   : > { %1627 = shalt.err (!%p1624_p5)
}
 0x19b   : > { %s1628_s29 = scalar_lea.hbm %s2160_s15, 2048  ;;  %s1632_s20 = scalar_lea.hbm %s2217_s3, 4096 }
 0x19c   : > { %p1629_p9 = scmp.ne.s32.totalorder %s2160_s15, %s1628_s29  ;;  %p1633_p3 = scmp.lt.u32.totalorder %s2160_s15, %s2217_s3 }
 0x19d   : > { %p1634_p7 = scmp.lt.u32.totalorder %s1632_s20, %s1628_s29  ;;  %p1636_p4 = scmp.lt.u32.totalorder %s1628_s29, %s2160_s15 }
 0x19e   : > { %p1630_p1 = pnand %p1629_p9, %p1827_p10 }
 0x19f   : > { %p1635_p13 = por %p1634_p7, %p1633_p3 }
 0x1a0   : > { %p1631_p2 = pneg %p1630_p1 }
 0x1a1   : > { %p1637_p6 = por %p1636_p4, %p1635_p13 }
 0x1a3   : > { %p1638_p8 = pnand %p1637_p6, %p1631_p2 }
 0x1a5   : > { %1641 = shalt.err (!%p1638_p8)
}
 0x1a6   : > { %s1709_s9 = smov 64   ;;  %s1710_s10 = smov 4  }
 0x1a7   : > { %1351 = dma.vmem_to_hbm [thread:$0]  (%p1827_p10), %s2162_s11, 2048, %s2160_s15, %s924_s7, %s1709_s9, %s1709_s9, %s1710_s10  }
 0x1a8 PF: > { %s953_s18 = sand.u32 1, %s1680_s12   ;;  %p2235_p12 = scmp.ne.s32.totalorder %s2225_s23, 0 }
 0x1a9   : > { %p2236_p11 = scmp.ge.s32.totalorder %s1700_s17, 2  ;;  %s954_s26 = scalar_lea.sflag [#allocation4], %s953_s18 }
 0x1ab   : > { %p1362_p0 = pnand %p2236_p11, %p2235_p12 }
 0x1ad   : > { %1675 = dma.done.wait (!%p1362_p0), %s954_s26, 2048  }
 0x1ae   : > { %1677 = vsyncadd (!%p1362_p0), %s954_s26, 4294965248  ;;  %s20_s17 = sadd.s32 1, %s1700_s17   ;;  %s2237_s12 = smov %s1684_s13 }
 0x1af   : > { %p17_p5 = scmp.ge.s32.totalorder %s20_s17, 4   ;;  %s2238_s13 = smov %s1688_s14 }
 0x1b0   : > { %s2239_s14 = smov %s1836_s5  ;;  %s2240_s15 = smov %s1696_s16 }
 0x1b1   : > { %s2241_s16 = smov %s2243_s28  ;;  %19 = sbr.rel (!%p17_p5) target bundleno = 7 (0x7), region = 85 }
 0x1b8   :  { %959 = vsyncpa [#allocation3], 1 }
 0x1b9   :  { %961 = vsyncpa [#allocation3 + $0x1], 1 }
 0x1ba   :  { %962 = vsyncpa [#allocation6], 1 }
 0x1bb   :  { %963 = vsyncpa [#allocation4], 1 }
 0x1bc   :  { %965 = vsyncpa [#allocation4 + $0x1], 1 }

</bundles_post_ra>
